<compile_context>
chip_gen: v6e
topology: v6e:2x2x1
jax: 0.10.0
libtpu: 0.0.40
codegen_flags: <defaults>
</compile_context>

<pallas_src>
import jax
import jax.numpy as jnp
from jax.experimental import pallas as pl
from jax.experimental.pallas import tpu as pltpu


def _round_up(x, m):
    return ((x + m - 1) // m) * m


def _ggipnn_fused_kernel(ids_ref, emb_ref, w1_ref, b1_ref, w2_ref, b2_ref,
                         w3_ref, b3_ref, o_ref):
    TB, S = ids_ref.shape
    V_pad, E = emb_ref.shape
    H_pad = w2_ref.shape[0]

    ids = ids_ref[...]                 # (TB, S) int32
    emb = emb_ref[...]                 # (V_pad, E)
    w1 = w1_ref[...]                   # (S*E, H_pad)
    # Hoist bias loads once per invocation (no re-broadcast inside loops).
    b1 = b1_ref[...]                   # (1, H_pad)
    b2 = b2_ref[...]                   # (1, H_pad)
    b3 = b3_ref[...]                   # (1, C_pad)

    # --- fc1 fused with the embedding gather ------------------------------
    # one_hot(ids[:, s]) @ emb  ==  emb[ids[:, s]]   (exact: single nonzero)
    lane_iota = jax.lax.broadcasted_iota(jnp.int32, (TB, V_pad), 1)
    acc = jnp.zeros((TB, H_pad), dtype=jnp.float32)
    for s in range(S):                 # static unroll, S is small
        one_hot = jnp.where(lane_iota == ids[:, s:s + 1], 1.0, 0.0)
        emb_s = jnp.dot(one_hot, emb, preferred_element_type=jnp.float32)
        acc = acc + jnp.dot(emb_s, w1[s * E:(s + 1) * E, :],
                            preferred_element_type=jnp.float32)
    h = jnp.maximum(acc + b1, 0.0)
    # (dropout: identity in eval mode)

    # --- fc2 + ReLU --------------------------------------------------------
    h = jnp.maximum(
        jnp.dot(h, w2_ref[...], preferred_element_type=jnp.float32) + b2, 0.0)
    # (dropout: identity in eval mode)

    # --- fc3 (logits) ------------------------------------------------------
    out = jnp.dot(h, w3_ref[...], preferred_element_type=jnp.float32) + b3
    o_ref[...] = out.astype(o_ref.dtype)


def ggipnn_forward(x_ids, params):
    """x_ids: (B, S) int32 token indices. Returns (B, num_classes) float32."""
    emb_w = params["embedding"]          # (V, E)
    w1, b1 = params["w1"], params["b1"]  # (S*E, H), (1, H)
    w2, b2 = params["w2"], params["b2"]  # (H, H),   (1, H)
    w3, b3 = params["w3"], params["b3"]  # (H, C),   (1, C)

    B, S = x_ids.shape
    V, E = emb_w.shape
    H = w2.shape[0]
    C = w3.shape[1]

    # Lane/sublane-friendly padded sizes.
    H_pad = _round_up(H, 128)
    C_pad = _round_up(C, 128)
    V_pad = _round_up(V, 128)
    TB = min(256, _round_up(B, 8))       # batch tile (multiple of 8)
    B_pad = _round_up(B, TB)

    # Zero-pad weights / ids once; padded rows/cols contribute exactly zero.
    emb_p = jnp.pad(emb_w, ((0, V_pad - V), (0, 0)))
    w1_p = jnp.pad(w1, ((0, 0), (0, H_pad - H)))
    b1_p = jnp.pad(b1, ((0, 0), (0, H_pad - H)))
    w2_p = jnp.pad(w2, ((0, H_pad - H), (0, H_pad - H)))
    b2_p = jnp.pad(b2, ((0, 0), (0, H_pad - H)))
    w3_p = jnp.pad(w3, ((0, H_pad - H), (0, C_pad - C)))
    b3_p = jnp.pad(b3, ((0, 0), (0, C_pad - C)))
    ids_p = jnp.pad(x_ids, ((0, B_pad - B), (0, 0)))

    grid = (B_pad // TB,)

    def resident(shape):
        # Full-array block, same block for every grid step -> stays in VMEM.
        return pl.BlockSpec(shape, lambda i: (0, 0))

    flops = 2 * B_pad * (S * (V_pad * E + E * H_pad)
                         + H_pad * H_pad + H_pad * C_pad)
    bytes_accessed = 4 * (B_pad * S + V_pad * E + S * E * H_pad + H_pad
                          + H_pad * H_pad + H_pad + H_pad * C_pad + C_pad
                          + B_pad * C_pad)

    out_padded = pl.pallas_call(
        _ggipnn_fused_kernel,
        out_shape=jax.ShapeDtypeStruct((B_pad, C_pad), jnp.float32),
        grid=grid,
        in_specs=[
            pl.BlockSpec((TB, S), lambda i: (i, 0)),          # ids (streamed)
            resident(emb_p.shape),                            # embedding
            resident(w1_p.shape), resident(b1_p.shape),       # fc1
            resident(w2_p.shape), resident(b2_p.shape),       # fc2
            resident(w3_p.shape), resident(b3_p.shape),       # fc3
        ],
        out_specs=pl.BlockSpec((TB, C_pad), lambda i: (i, 0)),
        compiler_params=pltpu.CompilerParams(
            dimension_semantics=("parallel",),
            vmem_limit_bytes=32 * 1024 * 1024),
        cost_estimate=pl.CostEstimate(flops=int(flops),
                                      transcendentals=0,
                                      bytes_accessed=int(bytes_accessed)),
    )(ids_p, emb_p, w1_p, b1_p, w2_p, b2_p, w3_p, b3_p)

    return out_padded[:B, :C]


def init_params(key, sequence_length, num_classes, vocab_size, embedding_size,
                hidden_dimension):
    """Deterministic synthetic parameter init (mimics the module's shapes).

    Linear weights are stored as (in, out), so x @ W + b is mathematically
    identical to PyTorch's x @ W.T + b with W stored as (out, in).
    """
    k_emb, k1, k2, k3, kb1, kb2, kb3 = jax.random.split(key, 7)
    in1 = sequence_length * embedding_size
    params = {
        # nn.init.uniform_(embedding.weight, -1.0, 1.0)
        "embedding": jax.random.uniform(
            k_emb, (vocab_size, embedding_size),
            minval=-1.0, maxval=1.0, dtype=jnp.float32),
        "w1": jax.random.uniform(k1, (in1, hidden_dimension),
                                 minval=-1.0, maxval=1.0,
                                 dtype=jnp.float32) / jnp.sqrt(in1),
        "b1": jax.random.uniform(kb1, (1, hidden_dimension),
                                 minval=-1.0, maxval=1.0,
                                 dtype=jnp.float32) / jnp.sqrt(in1),
        "w2": jax.random.uniform(k2, (hidden_dimension, hidden_dimension),
                                 minval=-1.0, maxval=1.0,
                                 dtype=jnp.float32) / jnp.sqrt(hidden_dimension),
        "b2": jax.random.uniform(kb2, (1, hidden_dimension),
                                 minval=-1.0, maxval=1.0,
                                 dtype=jnp.float32) / jnp.sqrt(hidden_dimension),
        "w3": jax.random.uniform(k3, (hidden_dimension, num_classes),
                                 minval=-1.0, maxval=1.0,
                                 dtype=jnp.float32) / jnp.sqrt(hidden_dimension),
        "b3": jax.random.uniform(kb3, (1, num_classes),
                                 minval=-1.0, maxval=1.0,
                                 dtype=jnp.float32) / jnp.sqrt(hidden_dimension),
    }
    return params


def _reference_forward(x_ids, params):
    """Pure-JAX reference for the correctness check."""
    emb = jnp.take(params["embedding"], x_ids, axis=0)
    B = x_ids.shape[0]
    h = emb.reshape(B, -1)
    h = jnp.maximum(h @ params["w1"] + params["b1"], 0.0)
    h = jnp.maximum(h @ params["w2"] + params["b2"], 0.0)
    return h @ params["w3"] + params["b3"]


if __name__ == "__main__":
    # Small, self-consistent shapes.
    sequence_length = 8
    num_classes = 4
    vocab_size = 64
    embedding_size = 16
    hidden_dimension = 32
    batch = 2

    key = jax.random.PRNGKey(0)
    k_params, k_ids = jax.random.split(key)
    params = init_params(k_params, sequence_length, num_classes, vocab_size,
                         embedding_size, hidden_dimension)
    x_ids = jax.random.randint(k_ids, (batch, sequence_length),
                               minval=0, maxval=vocab_size, dtype=jnp.int32)

    out = ggipnn_forward(x_ids, params)
    out = jax.block_until_ready(out)

    ref = _reference_forward(x_ids, params)
    assert out.shape == (batch, num_classes)
    assert jnp.allclose(out, ref, atol=1e-4, rtol=1e-4)

    print("KERNEL_OK")
</pallas_src>

<mosaic_0001>
module attributes {stable_mosaic.version = 11 : i64} {
  func.func @_ggipnn_fused_kernel(%arg0: i32, %arg1: memref<8x8xi32, #tpu.memory_space<vmem>>, %arg2: memref<128x16xf32, #tpu.memory_space<vmem>>, %arg3: memref<128x128xf32, #tpu.memory_space<vmem>>, %arg4: memref<1x128xf32, #tpu.memory_space<vmem>>, %arg5: memref<128x128xf32, #tpu.memory_space<vmem>>, %arg6: memref<1x128xf32, #tpu.memory_space<vmem>>, %arg7: memref<128x128xf32, #tpu.memory_space<vmem>>, %arg8: memref<1x128xf32, #tpu.memory_space<vmem>>, %arg9: memref<8x128xf32, #tpu.memory_space<vmem>>) attributes {dimension_semantics = [#tpu.dimension_semantics<parallel>], iteration_bounds = array<i64: 1>, scalar_prefetch = 0 : i64, scratch_operands = 0 : i64, tpu.core_type = #tpu.core_type<tc>, window_params = [{transform_indices = @transform_0, window_bounds = array<i64: 8, 8>}, {pipeline_mode = #tpu.pipeline_mode<synchronous>, transform_indices = @transform_1, window_bounds = array<i64: 128, 16>}, {pipeline_mode = #tpu.pipeline_mode<synchronous>, transform_indices = @transform_2, window_bounds = array<i64: 128, 128>}, {pipeline_mode = #tpu.pipeline_mode<synchronous>, transform_indices = @transform_3, window_bounds = array<i64: 1, 128>}, {pipeline_mode = #tpu.pipeline_mode<synchronous>, transform_indices = @transform_4, window_bounds = array<i64: 128, 128>}, {pipeline_mode = #tpu.pipeline_mode<synchronous>, transform_indices = @transform_5, window_bounds = array<i64: 1, 128>}, {pipeline_mode = #tpu.pipeline_mode<synchronous>, transform_indices = @transform_6, window_bounds = array<i64: 128, 128>}, {pipeline_mode = #tpu.pipeline_mode<synchronous>, transform_indices = @transform_7, window_bounds = array<i64: 1, 128>}, {transform_indices = @transform_8, window_bounds = array<i64: 8, 128>}]} {
    %c0 = arith.constant 0 : index
    %c0_0 = arith.constant 0 : index
    %0 = vector.load %arg1[%c0, %c0_0] : memref<8x8xi32, #tpu.memory_space<vmem>>, vector<8x8xi32>
    %c0_1 = arith.constant 0 : index
    %c0_2 = arith.constant 0 : index
    %1 = vector.load %arg2[%c0_1, %c0_2] : memref<128x16xf32, #tpu.memory_space<vmem>>, vector<128x16xf32>
    %c0_3 = arith.constant 0 : index
    %c0_4 = arith.constant 0 : index
    %2 = vector.load %arg3[%c0_3, %c0_4] : memref<128x128xf32, #tpu.memory_space<vmem>>, vector<128x128xf32>
    %c0_5 = arith.constant 0 : index
    %c0_6 = arith.constant 0 : index
    %3 = vector.load %arg4[%c0_5, %c0_6] : memref<1x128xf32, #tpu.memory_space<vmem>>, vector<1x128xf32>
    %c0_7 = arith.constant 0 : index
    %c0_8 = arith.constant 0 : index
    %4 = vector.load %arg6[%c0_7, %c0_8] : memref<1x128xf32, #tpu.memory_space<vmem>>, vector<1x128xf32>
    %c0_9 = arith.constant 0 : index
    %c0_10 = arith.constant 0 : index
    %5 = vector.load %arg8[%c0_9, %c0_10] : memref<1x128xf32, #tpu.memory_space<vmem>>, vector<1x128xf32>
    %6 = tpu.iota {dimensions = array<i32: 1>} : vector<8x128xi32>
    %cst = arith.constant 0.000000e+00 : f32
    %7 = vector.broadcast %cst : f32 to vector<8x128xf32>
    %8 = vector.extract_strided_slice %0 {offsets = [0, 0], sizes = [8, 1], strides = [1, 1]} : vector<8x8xi32> to vector<8x1xi32>
    %9 = vector.broadcast %8 : vector<8x1xi32> to vector<8x128xi32>
    %10 = arith.cmpi eq, %6, %9 : vector<8x128xi32>
    %cst_11 = arith.constant 1.000000e+00 : f32
    %cst_12 = arith.constant 0.000000e+00 : f32
    %11 = vector.broadcast %cst_11 : f32 to vector<8x128xf32>
    %12 = vector.broadcast %cst_12 : f32 to vector<8x128xf32>
    %13 = arith.select %10, %11, %12 : vector<8x128xi1>, vector<8x128xf32>
    %cst_13 = arith.constant dense<0.000000e+00> : vector<8x16xf32>
    %14 = tpu.matmul %13, %1, %cst_13 {dimension_numbers = #tpu.dot_dimension_numbers<[1], [0], [0], [1], [0, 0, 1, 1], [], []>} : vector<8x128xf32>, vector<128x16xf32>, vector<8x16xf32> -> vector<8x16xf32>
    %15 = vector.extract_strided_slice %2 {offsets = [0, 0], sizes = [16, 128], strides = [1, 1]} : vector<128x128xf32> to vector<16x128xf32>
    %cst_14 = arith.constant dense<0.000000e+00> : vector<8x128xf32>
    %16 = tpu.matmul %14, %15, %cst_14 {dimension_numbers = #tpu.dot_dimension_numbers<[1], [0], [0], [1], [0, 0, 1, 1], [], []>} : vector<8x16xf32>, vector<16x128xf32>, vector<8x128xf32> -> vector<8x128xf32>
    %17 = arith.addf %7, %16 : vector<8x128xf32>
    %18 = vector.extract_strided_slice %0 {offsets = [0, 1], sizes = [8, 1], strides = [1, 1]} : vector<8x8xi32> to vector<8x1xi32>
    %19 = vector.broadcast %18 : vector<8x1xi32> to vector<8x128xi32>
    %20 = arith.cmpi eq, %6, %19 : vector<8x128xi32>
    %cst_15 = arith.constant 1.000000e+00 : f32
    %cst_16 = arith.constant 0.000000e+00 : f32
    %21 = vector.broadcast %cst_15 : f32 to vector<8x128xf32>
    %22 = vector.broadcast %cst_16 : f32 to vector<8x128xf32>
    %23 = arith.select %20, %21, %22 : vector<8x128xi1>, vector<8x128xf32>
    %cst_17 = arith.constant dense<0.000000e+00> : vector<8x16xf32>
    %24 = tpu.matmul %23, %1, %cst_17 {dimension_numbers = #tpu.dot_dimension_numbers<[1], [0], [0], [1], [0, 0, 1, 1], [], []>} : vector<8x128xf32>, vector<128x16xf32>, vector<8x16xf32> -> vector<8x16xf32>
    %25 = vector.extract_strided_slice %2 {offsets = [16, 0], sizes = [16, 128], strides = [1, 1]} : vector<128x128xf32> to vector<16x128xf32>
    %cst_18 = arith.constant dense<0.000000e+00> : vector<8x128xf32>
    %26 = tpu.matmul %24, %25, %cst_18 {dimension_numbers = #tpu.dot_dimension_numbers<[1], [0], [0], [1], [0, 0, 1, 1], [], []>} : vector<8x16xf32>, vector<16x128xf32>, vector<8x128xf32> -> vector<8x128xf32>
    %27 = arith.addf %17, %26 : vector<8x128xf32>
    %28 = vector.extract_strided_slice %0 {offsets = [0, 2], sizes = [8, 1], strides = [1, 1]} : vector<8x8xi32> to vector<8x1xi32>
    %29 = vector.broadcast %28 : vector<8x1xi32> to vector<8x128xi32>
    %30 = arith.cmpi eq, %6, %29 : vector<8x128xi32>
    %cst_19 = arith.constant 1.000000e+00 : f32
    %cst_20 = arith.constant 0.000000e+00 : f32
    %31 = vector.broadcast %cst_19 : f32 to vector<8x128xf32>
    %32 = vector.broadcast %cst_20 : f32 to vector<8x128xf32>
    %33 = arith.select %30, %31, %32 : vector<8x128xi1>, vector<8x128xf32>
    %cst_21 = arith.constant dense<0.000000e+00> : vector<8x16xf32>
    %34 = tpu.matmul %33, %1, %cst_21 {dimension_numbers = #tpu.dot_dimension_numbers<[1], [0], [0], [1], [0, 0, 1, 1], [], []>} : vector<8x128xf32>, vector<128x16xf32>, vector<8x16xf32> -> vector<8x16xf32>
    %35 = vector.extract_strided_slice %2 {offsets = [32, 0], sizes = [16, 128], strides = [1, 1]} : vector<128x128xf32> to vector<16x128xf32>
    %cst_22 = arith.constant dense<0.000000e+00> : vector<8x128xf32>
    %36 = tpu.matmul %34, %35, %cst_22 {dimension_numbers = #tpu.dot_dimension_numbers<[1], [0], [0], [1], [0, 0, 1, 1], [], []>} : vector<8x16xf32>, vector<16x128xf32>, vector<8x128xf32> -> vector<8x128xf32>
    %37 = arith.addf %27, %36 : vector<8x128xf32>
    %38 = vector.extract_strided_slice %0 {offsets = [0, 3], sizes = [8, 1], strides = [1, 1]} : vector<8x8xi32> to vector<8x1xi32>
    %39 = vector.broadcast %38 : vector<8x1xi32> to vector<8x128xi32>
    %40 = arith.cmpi eq, %6, %39 : vector<8x128xi32>
    %cst_23 = arith.constant 1.000000e+00 : f32
    %cst_24 = arith.constant 0.000000e+00 : f32
    %41 = vector.broadcast %cst_23 : f32 to vector<8x128xf32>
    %42 = vector.broadcast %cst_24 : f32 to vector<8x128xf32>
    %43 = arith.select %40, %41, %42 : vector<8x128xi1>, vector<8x128xf32>
    %cst_25 = arith.constant dense<0.000000e+00> : vector<8x16xf32>
    %44 = tpu.matmul %43, %1, %cst_25 {dimension_numbers = #tpu.dot_dimension_numbers<[1], [0], [0], [1], [0, 0, 1, 1], [], []>} : vector<8x128xf32>, vector<128x16xf32>, vector<8x16xf32> -> vector<8x16xf32>
    %45 = vector.extract_strided_slice %2 {offsets = [48, 0], sizes = [16, 128], strides = [1, 1]} : vector<128x128xf32> to vector<16x128xf32>
    %cst_26 = arith.constant dense<0.000000e+00> : vector<8x128xf32>
    %46 = tpu.matmul %44, %45, %cst_26 {dimension_numbers = #tpu.dot_dimension_numbers<[1], [0], [0], [1], [0, 0, 1, 1], [], []>} : vector<8x16xf32>, vector<16x128xf32>, vector<8x128xf32> -> vector<8x128xf32>
    %47 = arith.addf %37, %46 : vector<8x128xf32>
    %48 = vector.extract_strided_slice %0 {offsets = [0, 4], sizes = [8, 1], strides = [1, 1]} : vector<8x8xi32> to vector<8x1xi32>
    %49 = vector.broadcast %48 : vector<8x1xi32> to vector<8x128xi32>
    %50 = arith.cmpi eq, %6, %49 : vector<8x128xi32>
    %cst_27 = arith.constant 1.000000e+00 : f32
    %cst_28 = arith.constant 0.000000e+00 : f32
    %51 = vector.broadcast %cst_27 : f32 to vector<8x128xf32>
    %52 = vector.broadcast %cst_28 : f32 to vector<8x128xf32>
    %53 = arith.select %50, %51, %52 : vector<8x128xi1>, vector<8x128xf32>
    %cst_29 = arith.constant dense<0.000000e+00> : vector<8x16xf32>
    %54 = tpu.matmul %53, %1, %cst_29 {dimension_numbers = #tpu.dot_dimension_numbers<[1], [0], [0], [1], [0, 0, 1, 1], [], []>} : vector<8x128xf32>, vector<128x16xf32>, vector<8x16xf32> -> vector<8x16xf32>
    %55 = vector.extract_strided_slice %2 {offsets = [64, 0], sizes = [16, 128], strides = [1, 1]} : vector<128x128xf32> to vector<16x128xf32>
    %cst_30 = arith.constant dense<0.000000e+00> : vector<8x128xf32>
    %56 = tpu.matmul %54, %55, %cst_30 {dimension_numbers = #tpu.dot_dimension_numbers<[1], [0], [0], [1], [0, 0, 1, 1], [], []>} : vector<8x16xf32>, vector<16x128xf32>, vector<8x128xf32> -> vector<8x128xf32>
    %57 = arith.addf %47, %56 : vector<8x128xf32>
    %58 = vector.extract_strided_slice %0 {offsets = [0, 5], sizes = [8, 1], strides = [1, 1]} : vector<8x8xi32> to vector<8x1xi32>
    %59 = vector.broadcast %58 : vector<8x1xi32> to vector<8x128xi32>
    %60 = arith.cmpi eq, %6, %59 : vector<8x128xi32>
    %cst_31 = arith.constant 1.000000e+00 : f32
    %cst_32 = arith.constant 0.000000e+00 : f32
    %61 = vector.broadcast %cst_31 : f32 to vector<8x128xf32>
    %62 = vector.broadcast %cst_32 : f32 to vector<8x128xf32>
    %63 = arith.select %60, %61, %62 : vector<8x128xi1>, vector<8x128xf32>
    %cst_33 = arith.constant dense<0.000000e+00> : vector<8x16xf32>
    %64 = tpu.matmul %63, %1, %cst_33 {dimension_numbers = #tpu.dot_dimension_numbers<[1], [0], [0], [1], [0, 0, 1, 1], [], []>} : vector<8x128xf32>, vector<128x16xf32>, vector<8x16xf32> -> vector<8x16xf32>
    %65 = vector.extract_strided_slice %2 {offsets = [80, 0], sizes = [16, 128], strides = [1, 1]} : vector<128x128xf32> to vector<16x128xf32>
    %cst_34 = arith.constant dense<0.000000e+00> : vector<8x128xf32>
    %66 = tpu.matmul %64, %65, %cst_34 {dimension_numbers = #tpu.dot_dimension_numbers<[1], [0], [0], [1], [0, 0, 1, 1], [], []>} : vector<8x16xf32>, vector<16x128xf32>, vector<8x128xf32> -> vector<8x128xf32>
    %67 = arith.addf %57, %66 : vector<8x128xf32>
    %68 = vector.extract_strided_slice %0 {offsets = [0, 6], sizes = [8, 1], strides = [1, 1]} : vector<8x8xi32> to vector<8x1xi32>
    %69 = vector.broadcast %68 : vector<8x1xi32> to vector<8x128xi32>
    %70 = arith.cmpi eq, %6, %69 : vector<8x128xi32>
    %cst_35 = arith.constant 1.000000e+00 : f32
    %cst_36 = arith.constant 0.000000e+00 : f32
    %71 = vector.broadcast %cst_35 : f32 to vector<8x128xf32>
    %72 = vector.broadcast %cst_36 : f32 to vector<8x128xf32>
    %73 = arith.select %70, %71, %72 : vector<8x128xi1>, vector<8x128xf32>
    %cst_37 = arith.constant dense<0.000000e+00> : vector<8x16xf32>
    %74 = tpu.matmul %73, %1, %cst_37 {dimension_numbers = #tpu.dot_dimension_numbers<[1], [0], [0], [1], [0, 0, 1, 1], [], []>} : vector<8x128xf32>, vector<128x16xf32>, vector<8x16xf32> -> vector<8x16xf32>
    %75 = vector.extract_strided_slice %2 {offsets = [96, 0], sizes = [16, 128], strides = [1, 1]} : vector<128x128xf32> to vector<16x128xf32>
    %cst_38 = arith.constant dense<0.000000e+00> : vector<8x128xf32>
    %76 = tpu.matmul %74, %75, %cst_38 {dimension_numbers = #tpu.dot_dimension_numbers<[1], [0], [0], [1], [0, 0, 1, 1], [], []>} : vector<8x16xf32>, vector<16x128xf32>, vector<8x128xf32> -> vector<8x128xf32>
    %77 = arith.addf %67, %76 : vector<8x128xf32>
    %78 = vector.extract_strided_slice %0 {offsets = [0, 7], sizes = [8, 1], strides = [1, 1]} : vector<8x8xi32> to vector<8x1xi32>
    %79 = vector.broadcast %78 : vector<8x1xi32> to vector<8x128xi32>
    %80 = arith.cmpi eq, %6, %79 : vector<8x128xi32>
    %cst_39 = arith.constant 1.000000e+00 : f32
    %cst_40 = arith.constant 0.000000e+00 : f32
    %81 = vector.broadcast %cst_39 : f32 to vector<8x128xf32>
    %82 = vector.broadcast %cst_40 : f32 to vector<8x128xf32>
    %83 = arith.select %80, %81, %82 : vector<8x128xi1>, vector<8x128xf32>
    %cst_41 = arith.constant dense<0.000000e+00> : vector<8x16xf32>
    %84 = tpu.matmul %83, %1, %cst_41 {dimension_numbers = #tpu.dot_dimension_numbers<[1], [0], [0], [1], [0, 0, 1, 1], [], []>} : vector<8x128xf32>, vector<128x16xf32>, vector<8x16xf32> -> vector<8x16xf32>
    %85 = vector.extract_strided_slice %2 {offsets = [112, 0], sizes = [16, 128], strides = [1, 1]} : vector<128x128xf32> to vector<16x128xf32>
    %cst_42 = arith.constant dense<0.000000e+00> : vector<8x128xf32>
    %86 = tpu.matmul %84, %85, %cst_42 {dimension_numbers = #tpu.dot_dimension_numbers<[1], [0], [0], [1], [0, 0, 1, 1], [], []>} : vector<8x16xf32>, vector<16x128xf32>, vector<8x128xf32> -> vector<8x128xf32>
    %87 = arith.addf %77, %86 : vector<8x128xf32>
    %88 = vector.broadcast %3 : vector<1x128xf32> to vector<8x128xf32>
    %89 = arith.addf %87, %88 : vector<8x128xf32>
    %cst_43 = arith.constant 0.000000e+00 : f32
    %90 = vector.broadcast %cst_43 : f32 to vector<8x128xf32>
    %91 = arith.maximumf %89, %90 : vector<8x128xf32>
    %c0_44 = arith.constant 0 : index
    %c0_45 = arith.constant 0 : index
    %92 = vector.load %arg5[%c0_44, %c0_45] : memref<128x128xf32, #tpu.memory_space<vmem>>, vector<128x128xf32>
    %cst_46 = arith.constant dense<0.000000e+00> : vector<8x128xf32>
    %93 = tpu.matmul %91, %92, %cst_46 {dimension_numbers = #tpu.dot_dimension_numbers<[1], [0], [0], [1], [0, 0, 1, 1], [], []>} : vector<8x128xf32>, vector<128x128xf32>, vector<8x128xf32> -> vector<8x128xf32>
    %94 = vector.broadcast %4 : vector<1x128xf32> to vector<8x128xf32>
    %95 = arith.addf %93, %94 : vector<8x128xf32>
    %cst_47 = arith.constant 0.000000e+00 : f32
    %96 = vector.broadcast %cst_47 : f32 to vector<8x128xf32>
    %97 = arith.maximumf %95, %96 : vector<8x128xf32>
    %c0_48 = arith.constant 0 : index
    %c0_49 = arith.constant 0 : index
    %98 = vector.load %arg7[%c0_48, %c0_49] : memref<128x128xf32, #tpu.memory_space<vmem>>, vector<128x128xf32>
    %cst_50 = arith.constant dense<0.000000e+00> : vector<8x128xf32>
    %99 = tpu.matmul %97, %98, %cst_50 {dimension_numbers = #tpu.dot_dimension_numbers<[1], [0], [0], [1], [0, 0, 1, 1], [], []>} : vector<8x128xf32>, vector<128x128xf32>, vector<8x128xf32> -> vector<8x128xf32>
    %100 = vector.broadcast %5 : vector<1x128xf32> to vector<8x128xf32>
    %101 = arith.addf %99, %100 : vector<8x128xf32>
    %c0_51 = arith.constant 0 : index
    %c0_52 = arith.constant 0 : index
    %102 = vector.load %arg9[%c0_51, %c0_52] : memref<8x128xf32, #tpu.memory_space<vmem>>, vector<8x128xf32>
    tpu.vector_store %arg9[%c0_51, %c0_52], %101 {strides = array<i32>} : memref<8x128xf32, #tpu.memory_space<vmem>>, vector<8x128xf32>,
    return
  }
  func.func @transform_0(%arg0: i32) -> (i32, i32) {
    %c0_i32 = arith.constant 0 : i32
    %c0_i32_0 = arith.constant 0 : i32
    return %arg0, %c0_i32 : i32, i32
  }
  func.func @transform_1(%arg0: i32) -> (i32, i32) {
    %c0_i32 = arith.constant 0 : i32
    %c0_i32_0 = arith.constant 0 : i32
    %c0_i32_1 = arith.constant 0 : i32
    return %c0_i32, %c0_i32_0 : i32, i32
  }
  func.func @transform_2(%arg0: i32) -> (i32, i32) {
    %c0_i32 = arith.constant 0 : i32
    %c0_i32_0 = arith.constant 0 : i32
    %c0_i32_1 = arith.constant 0 : i32
    return %c0_i32, %c0_i32_0 : i32, i32
  }
  func.func @transform_3(%arg0: i32) -> (i32, i32) {
    %c0_i32 = arith.constant 0 : i32
    %c0_i32_0 = arith.constant 0 : i32
    %c0_i32_1 = arith.constant 0 : i32
    return %c0_i32, %c0_i32_0 : i32, i32
  }
  func.func @transform_4(%arg0: i32) -> (i32, i32) {
    %c0_i32 = arith.constant 0 : i32
    %c0_i32_0 = arith.constant 0 : i32
    %c0_i32_1 = arith.constant 0 : i32
    return %c0_i32, %c0_i32_0 : i32, i32
  }
  func.func @transform_5(%arg0: i32) -> (i32, i32) {
    %c0_i32 = arith.constant 0 : i32
    %c0_i32_0 = arith.constant 0 : i32
    %c0_i32_1 = arith.constant 0 : i32
    return %c0_i32, %c0_i32_0 : i32, i32
  }
  func.func @transform_6(%arg0: i32) -> (i32, i32) {
    %c0_i32 = arith.constant 0 : i32
    %c0_i32_0 = arith.constant 0 : i32
    %c0_i32_1 = arith.constant 0 : i32
    return %c0_i32, %c0_i32_0 : i32, i32
  }
  func.func @transform_7(%arg0: i32) -> (i32, i32) {
    %c0_i32 = arith.constant 0 : i32
    %c0_i32_0 = arith.constant 0 : i32
    %c0_i32_1 = arith.constant 0 : i32
    return %c0_i32, %c0_i32_0 : i32, i32
  }
  func.func @transform_8(%arg0: i32) -> (i32, i32) {
    %c0_i32 = arith.constant 0 : i32
    %c0_i32_0 = arith.constant 0 : i32
    return %arg0, %c0_i32 : i32, i32
  }
}

</mosaic_0001>

<bundles_post_ra>
// kernel: tpu_custom_call.1
= control target key start
LH: loop header
LB: loop body
LE: loop exit
PB: predicated region body
PF: predicated region fallthrough
CT: control target
= control target key end

     0   :  { %13 = vsyncpa [#allocation3], 0  ;;  %s2796_s0 = inlined_call_operand.vmem [shape: s32[8,8], index: 0, kind: input, shape index: {}]   ;;  %s2797_s1 = inlined_call_operand.vmem [shape: f32[128,16], index: 1, kind: input, shape index: {}]   ;;  %s2798_s2 = inlined_call_operand.vmem [shape: f32[128,128], index: 2, kind: input, shape index: {}]   ;;  %s2799_s3 = inlined_call_operand.vmem [shape: f32[1,128], index: 3, kind: input, shape index: {}]   ;;  %s2800_s4 = inlined_call_operand.hbm [shape: f32[128,128], index: 4, kind: input, shape index: {}]   ;;  %s2801_s5 = inlined_call_operand.vmem [shape: f32[1,128], index: 5, kind: input, shape index: {}]   ;;  %s2802_s6 = inlined_call_operand.hbm [shape: f32[128,128], index: 6, kind: input, shape index: {}]   ;;  %s2803_s7 = inlined_call_operand.vmem [shape: f32[1,128], index: 7, kind: input, shape index: {}]   ;;  %s2804_s8 = inlined_call_operand.hbm [shape: f32[8,128], index: 8, kind: output, shape index: {}]  }
   0x1   :  { %14 = vsyncpa [#allocation6], 0 }
   0x2   :  { %15 = vsyncpa [#allocation4], 0  ;;  %s2207_s27 = smov [#allocation2]  }
   0x3   :  { %s29_s28 = sshll.u32 %s2207_s27, 4  ;;  %s30_s28 = int_to_ptr.vmem [resolvable:$true] %s29_s28 }
   0x4   :  { %s2149_s29 = scalar_lea.vmem %s30_s28, 2048  ;;  %p2154_p1 = scmp.lt.s32.totalorder %s30_s28, %s30_s28 }
   0x5   :  { %p2150_p0 = scmp.ne.s32.totalorder %s30_s28, %s2149_s29  ;;  %p2155_p2 = scmp.lt.s32.totalorder %s2149_s29, %s2149_s29 }
   0x7   :  { %p2156_p3 = por %p2155_p2, %p2154_p1 }
   0x9   :  { %p2157_p4 = pnand %p2156_p3, %p2150_p0 }
   0xb   :  { %2160 = shalt.err (!%p2157_p4)
}
   0xc   :  { %s2208_s30 = smov 128   ;;  %s2209_s9 = smov 8  }
   0xd   :  { %35 = dma.hbm_to_vmem [thread:$0]  %s2800_s4, 2048, %s30_s28, [#allocation3], %s2208_s30, %s2208_s30, %s2209_s9  }
   0xe   :  { %s2210_s12 = smov [#allocation5]  }
   0xf   :  { %s43_s13 = sshll.u32 %s2210_s12, 4  ;;  %s44_s13 = int_to_ptr.vmem [resolvable:$true] %s43_s13 }
  0x10   :  { %s2169_s14 = scalar_lea.vmem %s44_s13, 2048  ;;  %p2174_p6 = scmp.lt.s32.totalorder %s44_s13, %s44_s13 }
  0x11   :  { %p2170_p5 = scmp.ne.s32.totalorder %s44_s13, %s2169_s14  ;;  %p2175_p7 = scmp.lt.s32.totalorder %s2169_s14, %s2169_s14 }
  0x13   :  { %p2176_p8 = por %p2175_p7, %p2174_p6 }
  0x15   :  { %p2177_p9 = pnand %p2176_p8, %p2170_p5 }
  0x17   :  { %2180 = shalt.err (!%p2177_p9)
}
  0x18   :  { %49 = dma.hbm_to_vmem [thread:$0]  %s2802_s6, 2048, %s44_s13, [#allocation6], %s2208_s30, %s2208_s30, %s2209_s9  }
  0x19   :  { %2201 = dma.done.wait [#allocation3], 2048  }
  0x1a   :  { %2202 = vsyncadd [#allocation3], 4294965248 }
  0x1b   :  { %2203 = dma.done.wait [#allocation6], 2048  }
  0x1c   :  { %2204 = vsyncadd [#allocation6], 4294965248  ;;  %v2211_v0 = vmov 1   ;;  %v2212_v1 = vmov 0.0   ;;  %vm2213_vm0 = vmmov 0   ;;  %v2283_v2 = vld [vmem:[%s2796_s0] sm:$0xff]  ;;  %v94_v21 = vlaneseq }
  0x1d   :  { %2132 = vset.pattern.permute.xlu0 %v2211_v0  ;;  %1745 = vmatprep.subr.mxu1 %v2212_v1  ;;  %v2288_v3 = vld [vmem:[%s2797_s1 + $0x78] sm:$0xff]  ;;  %v2293_v4 = vld [vmem:[%s2797_s1 + $0x70] sm:$0xff]  ;;  %v2301_v5 = vld [vmem:[%s2797_s1 + $0x68] sm:$0xff]  ;;  %v2214_v7 = vmov 0   ;;  %v2215_v20 = vmov 2   ;;  %v2216_v24 = vmov 1.0  }
  0x1e   :  { %1710 = vmatprep.subr.mxu0 %v2212_v1  ;;  %1777 = vmatprep.mubr.msk.f32.mxu1 %vm2213_vm0, %v2212_v1  ;;  %v2310_v6 = vld [vmem:[%s2797_s1 + $0x60] sm:$0xff]  ;;  %v2319_v8 = vld [vmem:[%s2797_s1 + $0x58] sm:$0xff]  ;;  %v2328_v9 = vld [vmem:[%s2797_s1 + $0x50] sm:$0xff]  ;;  %v2432_v22 = vand.u32 127, %v94_v21  ;;  %v2217_v30 = vmov 3   ;;  %vm246_vm3 = vcmask 130048  }
  0x1f   :  { %1742 = vmatprep.mubr.msk.f32.mxu0 %vm2213_vm0, %v2212_v1  ;;  %172 = vperm.xlu0 %2132, %v2283_v2   ;;  %v2337_v10 = vld [vmem:[%s2797_s1 + $0x48] sm:$0xff]  ;;  %v2346_v11 = vld [vmem:[%s2797_s1 + $0x40] sm:$0xff]  ;;  %v2355_v12 = vld [vmem:[%s2797_s1 + $0x38] sm:$0xff]  ;;  %v2218_v38 = vmov 4   ;;  %v2219_v49 = vmov 5   ;;  %v2220_v58 = vmov 6  }
  0x20   :  { %1746 = vmatpush3.msra.mxu1 %v2288_v3  ;;  %1711 = vmatpush3.msra.mxu0 %v2288_v3  ;;  %v2364_v13 = vld [vmem:[%s2797_s1 + $0x30] sm:$0xff]  ;;  %v2373_v14 = vld [vmem:[%s2797_s1 + $0x28] sm:$0xff]  ;;  %v2382_v15 = vld [vmem:[%s2797_s1 + $0x20] sm:$0xff]  ;;  %v2221_v21 = vmov 7   ;;  %s2222_s10 = smov [#allocation7]  }
  0x21   :  { %1747 = vmatprep.subr.mxu1 %v2212_v1  ;;  %1712 = vmatprep.subr.mxu0 %v2212_v1  ;;  %v2391_v16 = vld [vmem:[%s2797_s1 + $0x18] sm:$0xff]  ;;  %v2400_v17 = vld [vmem:[%s2797_s1 + $0x10] sm:$0xff]  ;;  %v2409_v18 = vld [vmem:[%s2797_s1 + $0x8] sm:$0xff]  ;;  %s1487_s11 = sshll.u32 %s2222_s10, 4  ;;  %s1488_s11 = int_to_ptr.vmem [resolvable:$true] %s1487_s11 }
  0x22   :  { %1748 = vmatpush3.msra.mxu1 %v2293_v4  ;;  %1713 = vmatpush3.msra.mxu0 %v2293_v4  ;;  %v2418_v19 = vld [vmem:[%s2797_s1] sm:$0xff]  ;;  %v78_v26 = vld [vmem:[%s2798_s2 + $0x18] sm:$0xff]  ;;  %v77_v27 = vld [vmem:[%s2798_s2 + $0x10] sm:$0xff]  ;;  %s2181_s12 = scalar_lea.vmem %s1488_s11, 128  ;;  %p2186_p11 = scmp.lt.s32.totalorder %s1488_s11, %s1488_s11 }
  0x23   :  { %1749 = vmatprep.subr.mxu1 %v2212_v1  ;;  %2133 = vset.pattern.permute.xlu0 %v2214_v7  ;;  %v76_v28 = vld [vmem:[%s2798_s2 + $0x8] sm:$0xff]  ;;  %v75_v29 = vld [vmem:[%s2798_s2] sm:$0xff]  ;;  %v82_v47 = vld [vmem:[%s2798_s2 + $0x38] sm:$0xff]  ;;  %p2182_p10 = scmp.ne.s32.totalorder %s1488_s11, %s2181_s12  ;;  %p2187_p12 = scmp.lt.s32.totalorder %s2181_s12, %s2181_s12 }
  0x24   :  { %1750 = vmatpush3.msra.mxu1 %v2301_v5  ;;  %97 = vperm.xlu0 %2133, %v2283_v2   ;;  %v80_v36 = vld [vmem:[%s2798_s2 + $0x28] sm:$0xff]  ;;  %v79_v37 = vld [vmem:[%s2798_s2 + $0x20] sm:$0xff]  ;;  %v81_v48 = vld [vmem:[%s2798_s2 + $0x30] sm:$0xff] }
  0x25   :  { %1751 = vmatprep.subr.mxu1 %v2212_v1  ;;  %1714 = vmatprep.subr.mxu0 %v2212_v1  ;;  %v84_v56 = vld [vmem:[%s2798_s2 + $0x48] sm:$0xff]  ;;  %v83_v57 = vld [vmem:[%s2798_s2 + $0x40] sm:$0xff]  ;;  %v86_v7 = vld [vmem:[%s2798_s2 + $0x58] sm:$0xff]  ;;  %p2188_p13 = por %p2187_p12, %p2186_p11 }
  0x26   :  { %1752 = vmatpush3.msra.mxu1 %v2310_v6  ;;  %1715 = vmatpush3.msra.mxu0 %v2301_v5 }
  0x27   :  { %1753 = vmatprep.subr.mxu1 %v2212_v1  ;;  %1716 = vmatprep.subr.mxu0 %v2212_v1  ;;  %p2189_p0 = pnand %p2188_p13, %p2182_p10 }
  0x28   :  { %1754 = vmatpush3.msra.mxu1 %v2319_v8  ;;  %1717 = vmatpush3.msra.mxu0 %v2310_v6 }
  0x29   :  { %1755 = vmatprep.subr.mxu1 %v2212_v1  ;;  %1718 = vmatprep.subr.mxu0 %v2212_v1 }
  0x2a   :  { %1756 = vmatpush3.msra.mxu1 %v2328_v9  ;;  %1719 = vmatpush3.msra.mxu0 %v2319_v8 }
  0x2b   :  { %1757 = vmatprep.subr.mxu1 %v2212_v1  ;;  %1720 = vmatprep.subr.mxu0 %v2212_v1 }
  0x2c   :  { %1758 = vmatpush3.msra.mxu1 %v2337_v10  ;;  %1721 = vmatpush3.msra.mxu0 %v2328_v9 }
  0x2d   :  { %1759 = vmatprep.subr.mxu1 %v2212_v1  ;;  %1722 = vmatprep.subr.mxu0 %v2212_v1 }
  0x2e   :  { %1760 = vmatpush3.msra.mxu1 %v2346_v11  ;;  %1723 = vmatpush3.msra.mxu0 %v2337_v10 }
  0x2f   :  { %1761 = vmatprep.subr.mxu1 %v2212_v1  ;;  %1724 = vmatprep.subr.mxu0 %v2212_v1 }
  0x30   :  { %1762 = vmatpush3.msra.mxu1 %v2355_v12  ;;  %1725 = vmatpush3.msra.mxu0 %v2346_v11 }
  0x31   :  { %1763 = vmatprep.subr.mxu1 %v2212_v1  ;;  %1726 = vmatprep.subr.mxu0 %v2212_v1 }
  0x32   :  { %1764 = vmatpush3.msra.mxu1 %v2364_v13  ;;  %1727 = vmatpush3.msra.mxu0 %v2355_v12 }
  0x33   :  { %1765 = vmatprep.subr.mxu1 %v2212_v1  ;;  %1728 = vmatprep.subr.mxu0 %v2212_v1 }
  0x34   :  { %1766 = vmatpush3.msra.mxu1 %v2373_v14  ;;  %1729 = vmatpush3.msra.mxu0 %v2364_v13 }
  0x35   :  { %1767 = vmatprep.subr.mxu1 %v2212_v1  ;;  %1730 = vmatprep.subr.mxu0 %v2212_v1 }
  0x36   :  { %1768 = vmatpush3.msra.mxu1 %v2382_v15  ;;  %1731 = vmatpush3.msra.mxu0 %v2373_v14 }
  0x37   :  { %1769 = vmatprep.subr.mxu1 %v2212_v1  ;;  %1732 = vmatprep.subr.mxu0 %v2212_v1 }
  0x38   :  { %1770 = vmatpush3.msra.mxu1 %v2391_v16  ;;  %1733 = vmatpush3.msra.mxu0 %v2382_v15 }
  0x39   :  { %1771 = vmatprep.subr.mxu1 %v2212_v1  ;;  %1734 = vmatprep.subr.mxu0 %v2212_v1 }
  0x3a   :  { %1772 = vmatpush3.msra.mxu1 %v2400_v17  ;;  %1735 = vmatpush3.msra.mxu0 %v2391_v16 }
  0x3b   :  { %1773 = vmatprep.subr.mxu1 %v2212_v1  ;;  %1736 = vmatprep.subr.mxu0 %v2212_v1 }
  0x3c   :  { %1774 = vmatpush3.msra.mxu1 %v2409_v18  ;;  %1737 = vmatpush3.msra.mxu0 %v2400_v17 }
  0x3d   :  { %1775 = vmatprep.subr.mxu1 %v2212_v1  ;;  %1738 = vmatprep.subr.mxu0 %v2212_v1 }
  0x3e   :  { %1776 = vmatpush3.msra.mxu1 %v2418_v19  ;;  %1739 = vmatpush3.msra.mxu0 %v2409_v18 }
  0x3f   :  { %2134 = vset.pattern.permute.xlu1 %v2215_v20  ;;  %1740 = vmatprep.subr.mxu0 %v2212_v1  ;;  %v85_v20 = vld [vmem:[%s2798_s2 + $0x50] sm:$0xff] }
  0x40   :  { %394 = vperm.xlu1 %2134, %v2283_v2   ;;  %1741 = vmatpush3.msra.mxu0 %v2418_v19 }
  0x41   :  { %1787 = vmatprep.subr.mxu1 %v2212_v1  ;;  %1780 = vmatprep.subr.mxu0 %v2212_v1 }
  0x42   :  { %2137 = vset.pattern.permute.xlu0 %v2219_v49  ;;  %v1396_v49 = vld [vmem:[#allocation5 + $0x40] sm:$0xff] }
  0x43   :  { %841 = vperm.xlu0 %2137, %v2283_v2  }
  0x44   :  { %2135 = vset.pattern.permute.xlu1 %v2217_v30  ;;  %v87_v30 = vld [vmem:[%s2798_s2 + $0x60] sm:$0xff] }
  0x45   :  { %543 = vperm.xlu1 %2135, %v2283_v2  }
  0x47   :  { %2140 = vset.pattern.permute.xlu0 %v2221_v21 }
  0x49   :  { %2136 = vset.pattern.permute.xlu1 %v2218_v38  ;;  %v1298_v38 = vld [vmem:[#allocation2 + $0x18] sm:$0xff] }
  0x4a   :  { %692 = vperm.xlu1 %2136, %v2283_v2  }
  0x4e   :  { %2138 = vset.pattern.permute.xlu1 %v2220_v58 }
  0x4f   :  { %990 = vperm.xlu1 %2138, %v2283_v2  }
  0x53   :  { %2139 = vset.pattern.permute.xlu1 %v2221_v21 }
  0x54   :  { %1139 = vperm.xlu1 %2139, %v2283_v2  }
  0x9a   :  { %v173_v23 = vpop.permute.xlu0 %172 }
  0x9b   :  { %vm174_vm1 = vcmp.eq.s32.totalorder %v2432_v22, %v173_v23 }
  0x9c   :  { %1778 = vmatmul.mubr.msk.f32.vlgmr.msra.gmra.mxu1 %vm174_vm1, %v2216_v24 }
  0x9d   :  { %1791 = vmatprep.mubr.msk.f32.mxu1 %vm2213_vm0, %v2212_v1  ;;  %1788 = vmatpush3.msra.mxu1 %v76_v28 }
  0x9e   :  { %1789 = vmatprep.subr.mxu1 %v2212_v1 }
  0x9f   :  { %v98_v25 = vpop.permute.xlu0 %97  ;;  %1790 = vmatpush3.msra.mxu1 %v75_v29  ;;  %v88_v29 = vld [vmem:[%s2798_s2 + $0x68] sm:$0xff] }
  0xa0   :  { %vm99_vm2 = vcmp.eq.s32.totalorder %v2432_v22, %v98_v25  ;;  %1829 = vmatprep.subr.mxu1 %v2212_v1 }
  0xa1   :  { %1743 = vmatmul.mubr.msk.f32.vlgmr.msra.gmra.mxu0 %vm99_vm2, %v2216_v24 }
  0xa2   :  { %1781 = vmatpush3.msra.mxu0 %v78_v26  ;;  %1784 = vmatprep.mubr.msk.f32.mxu0 %vm2213_vm0, %v2212_v1 }
  0xa3   :  { %1782 = vmatprep.subr.mxu0 %v2212_v1 }
  0xa4   :  { %1783 = vmatpush3.msra.mxu0 %v77_v27 }
  0xa5   :  { %1794 = vmatprep.subr.mxu0 %v2212_v1 }
  0xbb   :  { %v395_v35 = vpop.permute.xlu1 %394 }
  0xbc   :  { %vm396_vm4 = vcmp.eq.s32.totalorder %v2432_v22, %v395_v35 }
  0xbe   :  { %v842_v0 = vpop.permute.xlu0 %841 }
  0xbf   :  { %vm843_vm7 = vcmp.eq.s32.totalorder %v2432_v22, %v842_v0  ;;  %v1514_v0 = vld [vmem:[%s2801_s5] ss:$0 sm:$0xff] }
  0xc0   :  { %v544_v46 = vpop.permute.xlu1 %543 }
  0xc1   :  { %vm545_vm5 = vcmp.eq.s32.totalorder %v2432_v22, %v544_v46  ;;  %v1399_v46 = vld [vmem:[#allocation5 + $0x58] sm:$0xff] }
  0xc5   :  { %v693_v55 = vpop.permute.xlu1 %692 }
  0xc6   :  { %vm694_vm6 = vcmp.eq.s32.totalorder %v2432_v22, %v693_v55  ;;  %v1513_v55 = vld [vmem:[%s2799_s3] ss:$0 sm:$0xff] }
  0xca   :  { %v991_v2 = vpop.permute.xlu1 %990 }
  0xcb   :  { %vm992_vm8 = vcmp.eq.s32.totalorder %v2432_v22, %v991_v2 }
 0x15c   :  { %v242_v31 = vpop.f32.mrf.mxu1 }
 0x15d   :  { %1785 = vmatmul.mubr.msk.f32.vlgmr.msra.gmra.mxu0 %vm246_vm3, %v242_v31 }
 0x15e   :  { %1795 = vmatpush3.msra.mxu0 %v2288_v3  ;;  %v1779_v32 = vpop.f32.mrf.mxu1  ;;  %1826 = vmatprep.mubr.msk.f32.mxu0 %vm2213_vm0, %v2212_v1 }
 0x15f   :  { %1796 = vmatprep.subr.mxu0 %v2212_v1 }
 0x160   :  { %1797 = vmatpush3.msra.mxu0 %v2293_v4 }
 0x161   :  { %1798 = vmatprep.subr.mxu0 %v2212_v1  ;;  %v167_v33 = vpop.f32.mrf.mxu0 }
 0x162   :  { %1799 = vmatpush3.msra.mxu0 %v2301_v5  ;;  %1792 = vmatmul.mubr.msk.f32.vlgmr.msra.gmra.mxu1 %vm246_vm3, %v167_v33 }
 0x163   :  { %1800 = vmatprep.subr.mxu0 %v2212_v1  ;;  %v1744_v34 = vpop.f32.mrf.mxu0  ;;  %1833 = vmatprep.mubr.msk.f32.mxu1 %vm2213_vm0, %v2212_v1 }
 0x164   :  { %1801 = vmatpush3.msra.mxu0 %v2310_v6  ;;  %1830 = vmatpush3.msra.mxu1 %v80_v36  ;;  %v1300_v36 = vld [vmem:[#allocation2 + $0x28] sm:$0xff] }
 0x165   :  { %1802 = vmatprep.subr.mxu0 %v2212_v1  ;;  %1831 = vmatprep.subr.mxu1 %v2212_v1 }
 0x166   :  { %1803 = vmatpush3.msra.mxu0 %v2319_v8  ;;  %1832 = vmatpush3.msra.mxu1 %v79_v37  ;;  %v1299_v37 = vld [vmem:[#allocation2 + $0x20] sm:$0xff] }
 0x167   :  { %1804 = vmatprep.subr.mxu0 %v2212_v1  ;;  %1836 = vmatprep.subr.mxu1 %v2212_v1 }
 0x168   :  { %1805 = vmatpush3.msra.mxu0 %v2328_v9 }
 0x169   :  { %1806 = vmatprep.subr.mxu0 %v2212_v1 }
 0x16a   :  { %1807 = vmatpush3.msra.mxu0 %v2337_v10 }
 0x16b   :  { %1808 = vmatprep.subr.mxu0 %v2212_v1 }
 0x16c   :  { %1809 = vmatpush3.msra.mxu0 %v2346_v11 }
 0x16d   :  { %1810 = vmatprep.subr.mxu0 %v2212_v1 }
 0x16e   :  { %1811 = vmatpush3.msra.mxu0 %v2355_v12 }
 0x16f   :  { %1812 = vmatprep.subr.mxu0 %v2212_v1 }
 0x170   :  { %1813 = vmatpush3.msra.mxu0 %v2364_v13 }
 0x171   :  { %1814 = vmatprep.subr.mxu0 %v2212_v1 }
 0x172   :  { %1815 = vmatpush3.msra.mxu0 %v2373_v14 }
 0x173   :  { %1816 = vmatprep.subr.mxu0 %v2212_v1 }
 0x174   :  { %1817 = vmatpush3.msra.mxu0 %v2382_v15 }
 0x175   :  { %1818 = vmatprep.subr.mxu0 %v2212_v1 }
 0x176   :  { %1819 = vmatpush3.msra.mxu0 %v2391_v16 }
 0x177   :  { %1820 = vmatprep.subr.mxu0 %v2212_v1 }
 0x178   :  { %1821 = vmatpush3.msra.mxu0 %v2400_v17 }
 0x179   :  { %1822 = vmatprep.subr.mxu0 %v2212_v1 }
 0x17a   :  { %1823 = vmatpush3.msra.mxu0 %v2409_v18 }
 0x17b   :  { %1824 = vmatprep.subr.mxu0 %v2212_v1 }
 0x17c   :  { %1825 = vmatpush3.msra.mxu0 %v2418_v19 }
 0x17d   :  { %1827 = vmatmul.mubr.msk.f32.vlgmr.msra.gmra.mxu0 %vm396_vm4, %v2216_v24  ;;  %1871 = vmatprep.subr.mxu0 %v2212_v1 }
 0x17e   :  { %1875 = vmatprep.mubr.msk.f32.mxu0 %vm2213_vm0, %v2212_v1  ;;  %1872 = vmatpush3.msra.mxu0 %v82_v47  ;;  %v1398_v47 = vld [vmem:[#allocation5 + $0x50] sm:$0xff] }
 0x17f   :  { %1873 = vmatprep.subr.mxu0 %v2212_v1 }
 0x180   :  { %1874 = vmatpush3.msra.mxu0 %v81_v48  ;;  %v1397_v48 = vld [vmem:[#allocation5 + $0x48] sm:$0xff] }
 0x181   :  { %1878 = vmatprep.subr.mxu0 %v2212_v1 }
 0x21d   :  { %v316_v39 = vpop.f32.mrf.mxu0 }
 0x21f   :  { %v1786_v40 = vpop.f32.mrf.mxu0 }
 0x220   :  { %v1296_v40 = vld [vmem:[#allocation2 + $0x8] sm:$0xff] }
 0x222   :  { %v389_v41 = vpop.f32.mrf.mxu1 }
 0x223   :  { %v390_v42 = vadd.f32 %v389_v41, %v316_v39  ;;  %v1297_v39 = vld [vmem:[#allocation2 + $0x10] sm:$0xff]  ;;  %v1295_v41 = vld [vmem:[#allocation2] sm:$0xff] }
 0x224   :  { %v1793_v43 = vpop.f32.mrf.mxu1 }
 0x225   :  { %v1402_v43 = vld [vmem:[#allocation5 + $0x70] sm:$0xff] }
 0x23d   :  { %v464_v44 = vpop.f32.mrf.mxu0 }
 0x23e   :  { %1834 = vmatmul.mubr.msk.f32.vlgmr.msra.gmra.mxu1 %vm246_vm3, %v464_v44  ;;  %v1401_v44 = vld [vmem:[#allocation5 + $0x68] sm:$0xff] }
 0x23f   :  { %1837 = vmatpush3.msra.mxu1 %v2288_v3  ;;  %v1828_v45 = vpop.f32.mrf.mxu0  ;;  %1868 = vmatprep.mubr.msk.f32.mxu1 %vm2213_vm0, %v2212_v1 }
 0x240   :  { %1838 = vmatprep.subr.mxu1 %v2212_v1  ;;  %v1400_v45 = vld [vmem:[#allocation5 + $0x60] sm:$0xff] }
 0x241   :  { %1839 = vmatpush3.msra.mxu1 %v2293_v4 }
 0x242   :  { %1840 = vmatprep.subr.mxu1 %v2212_v1 }
 0x243   :  { %1841 = vmatpush3.msra.mxu1 %v2301_v5 }
 0x244   :  { %1842 = vmatprep.subr.mxu1 %v2212_v1 }
 0x245   :  { %1843 = vmatpush3.msra.mxu1 %v2310_v6 }
 0x246   :  { %1844 = vmatprep.subr.mxu1 %v2212_v1 }
 0x247   :  { %1845 = vmatpush3.msra.mxu1 %v2319_v8 }
 0x248   :  { %1846 = vmatprep.subr.mxu1 %v2212_v1 }
 0x249   :  { %1847 = vmatpush3.msra.mxu1 %v2328_v9 }
 0x24a   :  { %1848 = vmatprep.subr.mxu1 %v2212_v1 }
 0x24b   :  { %1849 = vmatpush3.msra.mxu1 %v2337_v10 }
 0x24c   :  { %1850 = vmatprep.subr.mxu1 %v2212_v1 }
 0x24d   :  { %1851 = vmatpush3.msra.mxu1 %v2346_v11 }
 0x24e   :  { %1852 = vmatprep.subr.mxu1 %v2212_v1 }
 0x24f   :  { %1853 = vmatpush3.msra.mxu1 %v2355_v12 }
 0x250   :  { %1854 = vmatprep.subr.mxu1 %v2212_v1 }
 0x251   :  { %1855 = vmatpush3.msra.mxu1 %v2364_v13 }
 0x252   :  { %1856 = vmatprep.subr.mxu1 %v2212_v1 }
 0x253   :  { %1857 = vmatpush3.msra.mxu1 %v2373_v14 }
 0x254   :  { %1858 = vmatprep.subr.mxu1 %v2212_v1 }
 0x255   :  { %1859 = vmatpush3.msra.mxu1 %v2382_v15 }
 0x256   :  { %1860 = vmatprep.subr.mxu1 %v2212_v1 }
 0x257   :  { %1861 = vmatpush3.msra.mxu1 %v2391_v16 }
 0x258   :  { %1862 = vmatprep.subr.mxu1 %v2212_v1 }
 0x259   :  { %1863 = vmatpush3.msra.mxu1 %v2400_v17 }
 0x25a   :  { %1864 = vmatprep.subr.mxu1 %v2212_v1 }
 0x25b   :  { %1865 = vmatpush3.msra.mxu1 %v2409_v18 }
 0x25c   :  { %1866 = vmatprep.subr.mxu1 %v2212_v1 }
 0x25d   :  { %1867 = vmatpush3.msra.mxu1 %v2418_v19 }
 0x25e   :  { %1869 = vmatmul.mubr.msk.f32.vlgmr.msra.gmra.mxu1 %vm545_vm5, %v2216_v24  ;;  %1913 = vmatprep.subr.mxu1 %v2212_v1 }
 0x25f   :  { %1917 = vmatprep.mubr.msk.f32.mxu1 %vm2213_vm0, %v2212_v1  ;;  %1914 = vmatpush3.msra.mxu1 %v84_v56 }
 0x260   :  { %1915 = vmatprep.subr.mxu1 %v2212_v1 }
 0x261   :  { %1916 = vmatpush3.msra.mxu1 %v83_v57 }
 0x262   :  { %1920 = vmatprep.subr.mxu1 %v2212_v1 }
 0x2fe   :  { %v537_v50 = vpop.f32.mrf.mxu1 }
 0x2ff   :  { %v541_v51 = vadd.f32 %v537_v50, %v390_v42  ;;  %v1403_v42 = vld [vmem:[#allocation5 + $0x78] sm:$0xff] }
 0x300   :  { %v1835_v52 = vpop.f32.mrf.mxu1  ;;  %v1395_v50 = vld [vmem:[#allocation5 + $0x38] sm:$0xff] }
 0x301   :  { %v1393_v52 = vld [vmem:[#allocation5 + $0x28] sm:$0xff] }
 0x31e   :  { %v613_v53 = vpop.f32.mrf.mxu1 }
 0x31f   :  { %1876 = vmatmul.mubr.msk.f32.vlgmr.msra.gmra.mxu0 %vm246_vm3, %v613_v53  ;;  %v1392_v53 = vld [vmem:[#allocation5 + $0x20] sm:$0xff] }
 0x320   :  { %1879 = vmatpush3.msra.mxu0 %v2288_v3  ;;  %v1870_v54 = vpop.f32.mrf.mxu1  ;;  %1910 = vmatprep.mubr.msk.f32.mxu0 %vm2213_vm0, %v2212_v1 }
 0x321   :  { %1880 = vmatprep.subr.mxu0 %v2212_v1  ;;  %v1391_v54 = vld [vmem:[#allocation5 + $0x18] sm:$0xff] }
 0x322   :  { %1881 = vmatpush3.msra.mxu0 %v2293_v4 }
 0x323   :  { %1882 = vmatprep.subr.mxu0 %v2212_v1 }
 0x324   :  { %1883 = vmatpush3.msra.mxu0 %v2301_v5 }
 0x325   :  { %1884 = vmatprep.subr.mxu0 %v2212_v1 }
 0x326   :  { %1885 = vmatpush3.msra.mxu0 %v2310_v6 }
 0x327   :  { %1886 = vmatprep.subr.mxu0 %v2212_v1 }
 0x328   :  { %1887 = vmatpush3.msra.mxu0 %v2319_v8 }
 0x329   :  { %1888 = vmatprep.subr.mxu0 %v2212_v1 }
 0x32a   :  { %1889 = vmatpush3.msra.mxu0 %v2328_v9 }
 0x32b   :  { %1890 = vmatprep.subr.mxu0 %v2212_v1 }
 0x32c   :  { %1891 = vmatpush3.msra.mxu0 %v2337_v10 }
 0x32d   :  { %1892 = vmatprep.subr.mxu0 %v2212_v1 }
 0x32e   :  { %1893 = vmatpush3.msra.mxu0 %v2346_v11 }
 0x32f   :  { %1894 = vmatprep.subr.mxu0 %v2212_v1 }
 0x330   :  { %1895 = vmatpush3.msra.mxu0 %v2355_v12 }
 0x331   :  { %1896 = vmatprep.subr.mxu0 %v2212_v1 }
 0x332   :  { %1897 = vmatpush3.msra.mxu0 %v2364_v13 }
 0x333   :  { %1898 = vmatprep.subr.mxu0 %v2212_v1 }
 0x334   :  { %1899 = vmatpush3.msra.mxu0 %v2373_v14 }
 0x335   :  { %1900 = vmatprep.subr.mxu0 %v2212_v1 }
 0x336   :  { %1901 = vmatpush3.msra.mxu0 %v2382_v15 }
 0x337   :  { %1902 = vmatprep.subr.mxu0 %v2212_v1 }
 0x338   :  { %1903 = vmatpush3.msra.mxu0 %v2391_v16 }
 0x339   :  { %1904 = vmatprep.subr.mxu0 %v2212_v1 }
 0x33a   :  { %1905 = vmatpush3.msra.mxu0 %v2400_v17 }
 0x33b   :  { %1906 = vmatprep.subr.mxu0 %v2212_v1 }
 0x33c   :  { %1907 = vmatpush3.msra.mxu0 %v2409_v18 }
 0x33d   :  { %1908 = vmatprep.subr.mxu0 %v2212_v1 }
 0x33e   :  { %1909 = vmatpush3.msra.mxu0 %v2418_v19 }
 0x33f   :  { %1911 = vmatmul.mubr.msk.f32.vlgmr.msra.gmra.mxu0 %vm694_vm6, %v2216_v24  ;;  %1955 = vmatprep.subr.mxu0 %v2212_v1 }
 0x340   :  { %1959 = vmatprep.mubr.msk.f32.mxu0 %vm2213_vm0, %v2212_v1  ;;  %1956 = vmatpush3.msra.mxu0 %v86_v7 }
 0x341   :  { %1957 = vmatprep.subr.mxu0 %v2212_v1 }
 0x342   :  { %1958 = vmatpush3.msra.mxu0 %v85_v20 }
 0x343   :  { %1962 = vmatprep.subr.mxu0 %v2212_v1 }
 0x3df   :  { %v686_v59 = vpop.f32.mrf.mxu0 }
 0x3e0   :  { %v690_v60 = vadd.f32 %v686_v59, %v541_v51  ;;  %v1394_v51 = vld [vmem:[#allocation5 + $0x30] sm:$0xff] }
 0x3e1   :  { %v1877_v61 = vpop.f32.mrf.mxu0 }
 0x3e2   :  { %v1390_v61 = vld [vmem:[#allocation5 + $0x10] sm:$0xff] }
 0x3ff   :  { %v762_v62 = vpop.f32.mrf.mxu0 }
 0x400   :  { %1918 = vmatmul.mubr.msk.f32.vlgmr.msra.gmra.mxu1 %vm246_vm3, %v762_v62  ;;  %v1389_v62 = vld [vmem:[#allocation5 + $0x8] sm:$0xff] }
 0x401   :  { %1921 = vmatpush3.msra.mxu1 %v2288_v3  ;;  %v1912_v63 = vpop.f32.mrf.mxu0  ;;  %1952 = vmatprep.mubr.msk.f32.mxu1 %vm2213_vm0, %v2212_v1 }
 0x402   :  { %1922 = vmatprep.subr.mxu1 %v2212_v1  ;;  %v1388_v63 = vld [vmem:[#allocation5] sm:$0xff] }
 0x403   :  { %1923 = vmatpush3.msra.mxu1 %v2293_v4 }
 0x404   :  { %1924 = vmatprep.subr.mxu1 %v2212_v1 }
 0x405   :  { %1925 = vmatpush3.msra.mxu1 %v2301_v5 }
 0x406   :  { %1926 = vmatprep.subr.mxu1 %v2212_v1 }
 0x407   :  { %1927 = vmatpush3.msra.mxu1 %v2310_v6 }
 0x408   :  { %1928 = vmatprep.subr.mxu1 %v2212_v1 }
 0x409   :  { %1929 = vmatpush3.msra.mxu1 %v2319_v8 }
 0x40a   :  { %1930 = vmatprep.subr.mxu1 %v2212_v1 }
 0x40b   :  { %1931 = vmatpush3.msra.mxu1 %v2328_v9 }
 0x40c   :  { %1932 = vmatprep.subr.mxu1 %v2212_v1 }
 0x40d   :  { %1933 = vmatpush3.msra.mxu1 %v2337_v10 }
 0x40e   :  { %1934 = vmatprep.subr.mxu1 %v2212_v1 }
 0x40f   :  { %1935 = vmatpush3.msra.mxu1 %v2346_v11 }
 0x410   :  { %1936 = vmatprep.subr.mxu1 %v2212_v1 }
 0x411   :  { %1937 = vmatpush3.msra.mxu1 %v2355_v12 }
 0x412   :  { %1938 = vmatprep.subr.mxu1 %v2212_v1 }
 0x413   :  { %1939 = vmatpush3.msra.mxu1 %v2364_v13 }
 0x414   :  { %1940 = vmatprep.subr.mxu1 %v2212_v1 }
 0x415   :  { %1941 = vmatpush3.msra.mxu1 %v2373_v14 }
 0x416   :  { %1942 = vmatprep.subr.mxu1 %v2212_v1 }
 0x417   :  { %1943 = vmatpush3.msra.mxu1 %v2382_v15 }
 0x418   :  { %1944 = vmatprep.subr.mxu1 %v2212_v1 }
 0x419   :  { %1945 = vmatpush3.msra.mxu1 %v2391_v16 }
 0x41a   :  { %1946 = vmatprep.subr.mxu1 %v2212_v1 }
 0x41b   :  { %1947 = vmatpush3.msra.mxu1 %v2400_v17 }
 0x41c   :  { %1948 = vmatprep.subr.mxu1 %v2212_v1 }
 0x41d   :  { %1949 = vmatpush3.msra.mxu1 %v2409_v18 }
 0x41e   :  { %1950 = vmatprep.subr.mxu1 %v2212_v1 }
 0x41f   :  { %1951 = vmatpush3.msra.mxu1 %v2418_v19 }
 0x420   :  { %1953 = vmatmul.mubr.msk.f32.vlgmr.msra.gmra.mxu1 %vm843_vm7, %v2216_v24  ;;  %1997 = vmatprep.subr.mxu1 %v2212_v1 }
 0x421   :  { %2001 = vmatprep.mubr.msk.f32.mxu1 %vm2213_vm0, %v2212_v1  ;;  %1998 = vmatpush3.msra.mxu1 %v88_v29 }
 0x422   :  { %1999 = vmatprep.subr.mxu1 %v2212_v1 }
 0x423   :  { %2000 = vmatpush3.msra.mxu1 %v87_v30 }
 0x424   :  { %2004 = vmatprep.subr.mxu1 %v2212_v1 }
 0x4c0   :  { %v835_v23 = vpop.f32.mrf.mxu1 }
 0x4c1   :  { %v839_v25 = vadd.f32 %v835_v23, %v690_v60 }
 0x4c2   :  { %v1919_v26 = vpop.f32.mrf.mxu1 }
 0x4e0   :  { %v911_v27 = vpop.f32.mrf.mxu1 }
 0x4e1   :  { %1960 = vmatmul.mubr.msk.f32.vlgmr.msra.gmra.mxu0 %vm246_vm3, %v911_v27 }
 0x4e2   :  { %1963 = vmatpush3.msra.mxu0 %v2288_v3  ;;  %v1954_v28 = vpop.f32.mrf.mxu1  ;;  %1994 = vmatprep.mubr.msk.f32.mxu0 %vm2213_vm0, %v2212_v1 }
 0x4e3   :  { %1964 = vmatprep.subr.mxu0 %v2212_v1 }
 0x4e4   :  { %1965 = vmatpush3.msra.mxu0 %v2293_v4 }
 0x4e5   :  { %1966 = vmatprep.subr.mxu0 %v2212_v1 }
 0x4e6   :  { %1967 = vmatpush3.msra.mxu0 %v2301_v5 }
 0x4e7   :  { %1968 = vmatprep.subr.mxu0 %v2212_v1 }
 0x4e8   :  { %1969 = vmatpush3.msra.mxu0 %v2310_v6 }
 0x4e9   :  { %1970 = vmatprep.subr.mxu0 %v2212_v1 }
 0x4ea   :  { %1971 = vmatpush3.msra.mxu0 %v2319_v8 }
 0x4eb   :  { %1972 = vmatprep.subr.mxu0 %v2212_v1 }
 0x4ec   :  { %1973 = vmatpush3.msra.mxu0 %v2328_v9 }
 0x4ed   :  { %1974 = vmatprep.subr.mxu0 %v2212_v1 }
 0x4ee   :  { %1975 = vmatpush3.msra.mxu0 %v2337_v10 }
 0x4ef   :  { %1976 = vmatprep.subr.mxu0 %v2212_v1 }
 0x4f0   :  { %1977 = vmatpush3.msra.mxu0 %v2346_v11 }
 0x4f1   :  { %1978 = vmatprep.subr.mxu0 %v2212_v1 }
 0x4f2   :  { %1979 = vmatpush3.msra.mxu0 %v2355_v12 }
 0x4f3   :  { %1980 = vmatprep.subr.mxu0 %v2212_v1 }
 0x4f4   :  { %1981 = vmatpush3.msra.mxu0 %v2364_v13 }
 0x4f5   :  { %1982 = vmatprep.subr.mxu0 %v2212_v1 }
 0x4f6   :  { %1983 = vmatpush3.msra.mxu0 %v2373_v14 }
 0x4f7   :  { %1984 = vmatprep.subr.mxu0 %v2212_v1 }
 0x4f8   :  { %1985 = vmatpush3.msra.mxu0 %v2382_v15 }
 0x4f9   :  { %1986 = vmatprep.subr.mxu0 %v2212_v1 }
 0x4fa   :  { %1987 = vmatpush3.msra.mxu0 %v2391_v16 }
 0x4fb   :  { %1988 = vmatprep.subr.mxu0 %v2212_v1 }
 0x4fc   :  { %1989 = vmatpush3.msra.mxu0 %v2400_v17 }
 0x4fd   :  { %1990 = vmatprep.subr.mxu0 %v2212_v1 }
 0x4fe   :  { %1991 = vmatpush3.msra.mxu0 %v2409_v18 }
 0x4ff   :  { %1992 = vmatprep.subr.mxu0 %v2212_v1 }
 0x500   :  { %1993 = vmatpush3.msra.mxu0 %v2418_v19 }
 0x501   :  { %1995 = vmatmul.mubr.msk.f32.vlgmr.msra.gmra.mxu0 %vm992_vm8, %v2216_v24  ;;  %2039 = vmatprep.subr.mxu0 %v2212_v1 }
 0x502   :  { %2043 = vmatprep.mubr.msk.f32.mxu0 %vm2213_vm0, %v2212_v1 }
 0x5a1   :  { %v984_v31 = vpop.f32.mrf.mxu0 }
 0x5a2   :  { %v988_v32 = vadd.f32 %v984_v31, %v839_v25  ;;  %v1515_v25 = vld [vmem:[%s2803_s7] ss:$0 sm:$0xff] }
 0x5a3   :  { %v1961_v33 = vpop.f32.mrf.mxu0 }
 0x5c1   :  { %v1060_v34 = vpop.f32.mrf.mxu0 }
 0x5c2   :  { %2002 = vmatmul.mubr.msk.f32.vlgmr.msra.gmra.mxu1 %vm246_vm3, %v1060_v34 }
 0x5c3   :  { %2005 = vmatpush3.msra.mxu1 %v2288_v3  ;;  %v1996_v35 = vpop.f32.mrf.mxu0  ;;  %2036 = vmatprep.mubr.msk.f32.mxu1 %vm2213_vm0, %v2212_v1  ;;  %v1140_v3 = vpop.permute.xlu1 %1139 }
 0x5c4   :  { %2006 = vmatprep.subr.mxu1 %v2212_v1  ;;  %vm1141_vm9 = vcmp.eq.s32.totalorder %v2432_v22, %v1140_v3  ;;  %v1302_v22 = vld [vmem:[#allocation2 + $0x38] sm:$0xff] }
 0x5c5   :  { %2007 = vmatpush3.msra.mxu1 %v2293_v4  ;;  %v90_v4 = vld [vmem:[%s2798_s2 + $0x78] sm:$0xff] }
 0x5c6   :  { %2008 = vmatprep.subr.mxu1 %v2212_v1  ;;  %2040 = vmatpush3.msra.mxu0 %v90_v4 }
 0x5c7   :  { %2009 = vmatpush3.msra.mxu1 %v2301_v5  ;;  %v89_v5 = vld [vmem:[%s2798_s2 + $0x70] sm:$0xff]  ;;  %2041 = vmatprep.subr.mxu0 %v2212_v1 }
 0x5c8   :  { %2010 = vmatprep.subr.mxu1 %v2212_v1  ;;  %2042 = vmatpush3.msra.mxu0 %v89_v5 }
 0x5c9   :  { %2011 = vmatpush3.msra.mxu1 %v2310_v6  ;;  %2046 = vmatprep.subr.mxu0 %v2212_v1 }
 0x5ca   :  { %2012 = vmatprep.subr.mxu1 %v2212_v1 }
 0x5cb   :  { %2013 = vmatpush3.msra.mxu1 %v2319_v8 }
 0x5cc   :  { %2014 = vmatprep.subr.mxu1 %v2212_v1 }
 0x5cd   :  { %2015 = vmatpush3.msra.mxu1 %v2328_v9 }
 0x5ce   :  { %2016 = vmatprep.subr.mxu1 %v2212_v1 }
 0x5cf   :  { %2017 = vmatpush3.msra.mxu1 %v2337_v10  ;;  %v1310_v10 = vld [vmem:[#allocation2 + $0x78] sm:$0xff] }
 0x5d0   :  { %2018 = vmatprep.subr.mxu1 %v2212_v1 }
 0x5d1   :  { %2019 = vmatpush3.msra.mxu1 %v2346_v11 }
 0x5d2   :  { %2020 = vmatprep.subr.mxu1 %v2212_v1 }
 0x5d3   :  { %2021 = vmatpush3.msra.mxu1 %v2355_v12  ;;  %v1309_v12 = vld [vmem:[#allocation2 + $0x70] sm:$0xff] }
 0x5d4   :  { %2022 = vmatprep.subr.mxu1 %v2212_v1 }
 0x5d5   :  { %2023 = vmatpush3.msra.mxu1 %v2364_v13 }
 0x5d6   :  { %2024 = vmatprep.subr.mxu1 %v2212_v1 }
 0x5d7   :  { %2025 = vmatpush3.msra.mxu1 %v2373_v14  ;;  %v1308_v14 = vld [vmem:[#allocation2 + $0x68] sm:$0xff] }
 0x5d8   :  { %2026 = vmatprep.subr.mxu1 %v2212_v1 }
 0x5d9   :  { %2027 = vmatpush3.msra.mxu1 %v2382_v15  ;;  %v1307_v15 = vld [vmem:[#allocation2 + $0x60] sm:$0xff] }
 0x5da   :  { %2028 = vmatprep.subr.mxu1 %v2212_v1 }
 0x5db   :  { %2029 = vmatpush3.msra.mxu1 %v2391_v16  ;;  %v1306_v16 = vld [vmem:[#allocation2 + $0x58] sm:$0xff] }
 0x5dc   :  { %2030 = vmatprep.subr.mxu1 %v2212_v1 }
 0x5dd   :  { %2031 = vmatpush3.msra.mxu1 %v2400_v17  ;;  %v1305_v17 = vld [vmem:[#allocation2 + $0x50] sm:$0xff] }
 0x5de   :  { %2032 = vmatprep.subr.mxu1 %v2212_v1 }
 0x5df   :  { %2033 = vmatpush3.msra.mxu1 %v2409_v18  ;;  %v1304_v18 = vld [vmem:[#allocation2 + $0x48] sm:$0xff] }
 0x5e0   :  { %2034 = vmatprep.subr.mxu1 %v2212_v1 }
 0x5e1   :  { %2035 = vmatpush3.msra.mxu1 %v2418_v19  ;;  %v1303_v19 = vld [vmem:[#allocation2 + $0x40] sm:$0xff] }
 0x5e2   :  { %2037 = vmatmul.mubr.msk.f32.vlgmr.msra.gmra.mxu1 %vm1141_vm9, %v2216_v24  ;;  %2081 = vmatprep.subr.mxu1 %v2212_v1  ;;  %v1301_v24 = vld [vmem:[#allocation2 + $0x30] sm:$0xff] }
 0x5e3   :  { %2113 = vmatprep.mubr.msk.f32.mxu1 %vm2213_vm0, %v2212_v1  ;;  %2082 = vmatpush3.msra.mxu1 %v1403_v42 }
 0x5e4   :  { %2083 = vmatprep.subr.mxu1 %v2212_v1 }
 0x5e5   :  { %2084 = vmatpush3.msra.mxu1 %v1402_v43 }
 0x5e6   :  { %2085 = vmatprep.subr.mxu1 %v2212_v1 }
 0x5e7   :  { %2086 = vmatpush3.msra.mxu1 %v1401_v44 }
 0x5e8   :  { %2087 = vmatprep.subr.mxu1 %v2212_v1 }
 0x5e9   :  { %2088 = vmatpush3.msra.mxu1 %v1400_v45 }
 0x5ea   :  { %2089 = vmatprep.subr.mxu1 %v2212_v1 }
 0x5eb   :  { %2090 = vmatpush3.msra.mxu1 %v1399_v46 }
 0x5ec   :  { %2091 = vmatprep.subr.mxu1 %v2212_v1 }
 0x5ed   :  { %2092 = vmatpush3.msra.mxu1 %v1398_v47 }
 0x5ee   :  { %2093 = vmatprep.subr.mxu1 %v2212_v1 }
 0x5ef   :  { %2094 = vmatpush3.msra.mxu1 %v1397_v48 }
 0x5f0   :  { %2095 = vmatprep.subr.mxu1 %v2212_v1 }
 0x5f1   :  { %2096 = vmatpush3.msra.mxu1 %v1396_v49 }
 0x5f2   :  { %2097 = vmatprep.subr.mxu1 %v2212_v1 }
 0x5f3   :  { %2098 = vmatpush3.msra.mxu1 %v1395_v50 }
 0x5f4   :  { %2099 = vmatprep.subr.mxu1 %v2212_v1 }
 0x5f5   :  { %2100 = vmatpush3.msra.mxu1 %v1394_v51 }
 0x5f6   :  { %2101 = vmatprep.subr.mxu1 %v2212_v1 }
 0x5f7   :  { %2102 = vmatpush3.msra.mxu1 %v1393_v52 }
 0x5f8   :  { %2103 = vmatprep.subr.mxu1 %v2212_v1 }
 0x5f9   :  { %2104 = vmatpush3.msra.mxu1 %v1392_v53 }
 0x5fa   :  { %2105 = vmatprep.subr.mxu1 %v2212_v1 }
 0x5fb   :  { %2106 = vmatpush3.msra.mxu1 %v1391_v54 }
 0x5fc   :  { %2107 = vmatprep.subr.mxu1 %v2212_v1 }
 0x5fd   :  { %2108 = vmatpush3.msra.mxu1 %v1390_v61 }
 0x5fe   :  { %2109 = vmatprep.subr.mxu1 %v2212_v1 }
 0x5ff   :  { %2110 = vmatpush3.msra.mxu1 %v1389_v62 }
 0x600   :  { %2111 = vmatprep.subr.mxu1 %v2212_v1 }
 0x601   :  { %2112 = vmatpush3.msra.mxu1 %v1388_v63 }
 0x682   :  { %v1133_v6 = vpop.f32.mrf.mxu1 }
 0x683   :  { %v2748_v8 = vadd.f32 %v1133_v6, %v988_v32 }
 0x684   :  { %v2003_v9 = vpop.f32.mrf.mxu1 }
 0x6a2   :  { %v1209_v11 = vpop.f32.mrf.mxu1 }
 0x6a3   :  { %2044 = vmatmul.mubr.msk.f32.vlgmr.msra.gmra.mxu0 %vm246_vm3, %v1209_v11 }
 0x6a4   :  { %v2038_v13 = vpop.f32.mrf.mxu1  ;;  %2047 = vmatpush3.msra.mxu0 %v1310_v10  ;;  %2078 = vmatprep.mubr.msk.f32.mxu0 %vm2213_vm0, %v2212_v1 }
 0x6a5   :  { %2048 = vmatprep.subr.mxu0 %v2212_v1 }
 0x6a6   :  { %2049 = vmatpush3.msra.mxu0 %v1309_v12 }
 0x6a7   :  { %2050 = vmatprep.subr.mxu0 %v2212_v1 }
 0x6a8   :  { %2051 = vmatpush3.msra.mxu0 %v1308_v14 }
 0x6a9   :  { %2052 = vmatprep.subr.mxu0 %v2212_v1 }
 0x6aa   :  { %2053 = vmatpush3.msra.mxu0 %v1307_v15 }
 0x6ab   :  { %2054 = vmatprep.subr.mxu0 %v2212_v1 }
 0x6ac   :  { %2055 = vmatpush3.msra.mxu0 %v1306_v16 }
 0x6ad   :  { %2056 = vmatprep.subr.mxu0 %v2212_v1 }
 0x6ae   :  { %2057 = vmatpush3.msra.mxu0 %v1305_v17 }
 0x6af   :  { %2058 = vmatprep.subr.mxu0 %v2212_v1 }
 0x6b0   :  { %2059 = vmatpush3.msra.mxu0 %v1304_v18 }
 0x6b1   :  { %2060 = vmatprep.subr.mxu0 %v2212_v1 }
 0x6b2   :  { %2061 = vmatpush3.msra.mxu0 %v1303_v19 }
 0x6b3   :  { %2062 = vmatprep.subr.mxu0 %v2212_v1 }
 0x6b4   :  { %2063 = vmatpush3.msra.mxu0 %v1302_v22 }
 0x6b5   :  { %2064 = vmatprep.subr.mxu0 %v2212_v1 }
 0x6b6   :  { %2065 = vmatpush3.msra.mxu0 %v1301_v24 }
 0x6b7   :  { %2066 = vmatprep.subr.mxu0 %v2212_v1 }
 0x6b8   :  { %2067 = vmatpush3.msra.mxu0 %v1300_v36 }
 0x6b9   :  { %2068 = vmatprep.subr.mxu0 %v2212_v1 }
 0x6ba   :  { %2069 = vmatpush3.msra.mxu0 %v1299_v37 }
 0x6bb   :  { %2070 = vmatprep.subr.mxu0 %v2212_v1 }
 0x6bc   :  { %2071 = vmatpush3.msra.mxu0 %v1298_v38 }
 0x6bd   :  { %2072 = vmatprep.subr.mxu0 %v2212_v1 }
 0x6be   :  { %2073 = vmatpush3.msra.mxu0 %v1297_v39 }
 0x6bf   :  { %2074 = vmatprep.subr.mxu0 %v2212_v1 }
 0x6c0   :  { %2075 = vmatpush3.msra.mxu0 %v1296_v40 }
 0x6c1   :  { %2076 = vmatprep.subr.mxu0 %v2212_v1 }
 0x6c2   :  { %2077 = vmatpush3.msra.mxu0 %v1295_v41 }
 0x763   :  { %v1282_v56 = vpop.f32.mrf.mxu0 }
 0x764   :  { %v1286_v57 = vadd.f32 %v1282_v56, %v2748_v8 }
 0x765   :  { %v2045_v58 = vpop.f32.mrf.mxu0 }
 0x766   :  { %v1293_v59 = vadd.f32 %v1513_v55, %v1286_v57 }
 0x768   :  { %v1294_v60 = vmax.f32 %v1293_v59, 0.0 }
 0x76a   :  { %2079 = vmatmul.mubr.f32.vlgmr.msra.gmra.mxu0 %v1294_v60 }
 0x82a   :  { %v1383_v7 = vpop.f32.mrf.mxu0 }
 0x82b   :  { %v1384_v20 = vadd.f32 %v1514_v0, %v1383_v7 }
 0x82c   :  { %v2080_v21 = vpop.f32.mrf.mxu0 }
 0x82d   :  { %v1387_v23 = vmax.f32 %v1384_v20, 0.0 }
 0x82f   :  { %2114 = vmatmul.mubr.f32.vlgmr.msra.gmra.mxu1 %v1387_v23 }
 0x8ef   :  { %v1476_v26 = vpop.f32.mrf.mxu1 }
 0x8f0   :  { %v1477_v27 = vadd.f32 %v1515_v25, %v1476_v26 }
 0x8f1   :  { %v2115_v1 = vpop.f32.mrf.mxu1 }
 0x8f2   :  { %1480 = vst [vmem:[#allocation7] sm:$0xff] %v1477_v27 }
 0x8f3   :  { %2192 = shalt.err (!%p2189_p0)
}
 0x8f4   :  { %1490 = dma.vmem_to_hbm [thread:$0]  %s1488_s11, 128, %s2804_s8, [#allocation4]  }
 0x8f5   :  { %2205 = dma.done.wait [#allocation4], 128  }
 0x8f6   :  { %2206 = vsyncadd [#allocation4], 4294967168 }
 0x8f7   :  { %1494 = vsyncpa [#allocation3], 1 }
 0x8f8   :  { %1495 = vsyncpa [#allocation6], 1 }
 0x8f9   :  { %1496 = vsyncpa [#allocation4], 1 }

</bundles_post_ra>
